<compile_context>
chip_gen: v6e
topology: v6e:2x2x1
jax: 0.10.0
libtpu: 0.0.40
codegen_flags: <defaults>
</compile_context>

<pallas_src>
import jax
import jax.numpy as jnp
from jax.experimental import pallas as pl
from jax.experimental.pallas import tpu as pltpu

LANE = 128


def _round_up(n, m):
    return (n + m - 1) // m * m


def _leaky_relu(x, slope=0.01):
    # PyTorch nn.LeakyReLU default negative_slope = 0.01 (x == 0 -> 0, same).
    return jnp.where(x > 0, x, slope * x)


# ---------------------------------------------------------------------------
# Kernel: one batch tile, all three layers fused.
#   x_ref : [TB, S]      w1_ref : [S, P]   w2_ref : [P, P]   w3_ref : [P, P]
#   b_ref : [3, P]  (row 0 -> layer1 bias, row 1 -> layer2, row 2 -> layer3)
#   o_ref : [TB, P]  (only the first out_dim lanes are meaningful)
# ---------------------------------------------------------------------------
def actor_kernel(x_ref, w1_ref, w2_ref, w3_ref, b_ref, o_ref):
    x = x_ref[...]
    h = jnp.dot(x, w1_ref[...], preferred_element_type=jnp.float32) + b_ref[0:1, :]
    h = _leaky_relu(h)
    h = jnp.dot(h, w2_ref[...], preferred_element_type=jnp.float32) + b_ref[1:2, :]
    h = _leaky_relu(h)
    o = jnp.dot(h, w3_ref[...], preferred_element_type=jnp.float32) + b_ref[2:3, :]
    o_ref[...] = o.astype(o_ref.dtype)


# ---------------------------------------------------------------------------
# Host-side packing: pad all layer widths to a common lane-dense width P and
# pack the three biases into one array (7 params -> 4 kernel operands).
# ---------------------------------------------------------------------------
def pack_actor_params(params, lane=LANE):
    w1, b1, w2, b2, w3, b3 = params
    s, h = w1.shape
    _, l = w2.shape
    _, o = w3.shape
    p = _round_up(max(h, l, o), lane)

    w1p = jnp.zeros((s, p), jnp.float32).at[:, :h].set(w1)
    w2p = jnp.zeros((p, p), jnp.float32).at[:h, :l].set(w2)
    w3p = jnp.zeros((p, p), jnp.float32).at[:l, :o].set(w3)
    bp = (
        jnp.zeros((3, p), jnp.float32)
        .at[0, :h].set(b1.reshape(-1))
        .at[1, :l].set(b2.reshape(-1))
        .at[2, :o].set(b3.reshape(-1))
    )
    return (w1p, w2p, w3p, bp), o  # packed params, logical out_dim


# ---------------------------------------------------------------------------
# Wrapper: batch-tiled pallas_call.
# ---------------------------------------------------------------------------
def actor_forward(x, packed, out_dim, *, block_batch=512):
    w1p, w2p, w3p, bp = packed
    batch, s = x.shape
    p = w1p.shape[1]

    # Batch tile: multiple of 8 (sublane), capped so 2x double-buffered
    # (x tile + out tile) stays well under the smallest scoped-VMEM budget.
    tb = min(block_batch, _round_up(batch, 8))
    vmem_cap = 16 * 1024 * 1024  # conservative (v5e scoped default)
    tb_cap = max(8, (vmem_cap // (4 * 4 * (s + p))) // 8 * 8)
    tb = min(tb, tb_cap)
    grid = (pl.cdiv(batch, tb),)

    # Rough VMEM need: double-buffered x/out tiles + resident weights + slack.
    vmem_bytes = 4 * (2 * tb * (s + p) + s * p + 2 * p * p + 3 * p) + (1 << 20)
    vmem_bytes = min(vmem_bytes, 32 * 1024 * 1024)

    cost = pl.CostEstimate(
        flops=2 * batch * (s * p + p * p + p * p),
        transcendentals=0,
        bytes_accessed=4 * (batch * s + batch * p + s * p + 2 * p * p + 3 * p),
    )

    out_padded = pl.pallas_call(
        actor_kernel,
        out_shape=jax.ShapeDtypeStruct((batch, p), jnp.float32),
        grid_spec=pltpu.PrefetchScalarGridSpec(
            num_scalar_prefetch=0,
            grid=grid,
            in_specs=[
                pl.BlockSpec((tb, s), lambda i: (i, 0)),          # x: batch-tiled
                pl.BlockSpec((s, p), lambda i: (0, 0)),           # W1: resident
                pl.BlockSpec((p, p), lambda i: (0, 0)),           # W2: resident
                pl.BlockSpec((p, p), lambda i: (0, 0)),           # W3: resident
                pl.BlockSpec((3, p), lambda i: (0, 0)),           # packed biases
            ],
            out_specs=pl.BlockSpec((tb, p), lambda i: (i, 0)),    # lane-dense out
        ),
        compiler_params=pltpu.CompilerParams(
            dimension_semantics=("parallel",),   # v7x: shard batch grid over 2 TCs
            vmem_limit_bytes=int(vmem_bytes),
        ),
        cost_estimate=cost,
    )(x, w1p, w2p, w3p, bp)

    return out_padded[:, :out_dim]


# ---------------------------------------------------------------------------
# Init + pure-JAX reference (PyTorch-shaped logical params).
# ---------------------------------------------------------------------------
def init_actor_params(key, state_dim, discrete_dim, continuous_dim, hidden_dim=64):
    """Mimics PyTorch nn.Linear default init (uniform +-1/sqrt(fan_in))."""
    latent_dim = 32
    out_dim = discrete_dim + continuous_dim
    ks = jax.random.split(key, 6)

    def lin(kw, kb, fan_in, fan_out):
        bound = 1.0 / jnp.sqrt(fan_in)
        w = jax.random.uniform(kw, (fan_in, fan_out), jnp.float32, -bound, bound)
        b = jax.random.uniform(kb, (1, fan_out), jnp.float32, -bound, bound)
        return w, b

    w1, b1 = lin(ks[0], ks[1], state_dim, hidden_dim)
    w2, b2 = lin(ks[2], ks[3], hidden_dim, latent_dim)
    w3, b3 = lin(ks[4], ks[5], latent_dim, out_dim)
    return (w1, b1, w2, b2, w3, b3)


def actor_ref(x, params):
    w1, b1, w2, b2, w3, b3 = params
    h = _leaky_relu(x @ w1 + b1)
    h = _leaky_relu(h @ w2 + b2)
    return h @ w3 + b3


if __name__ == "__main__":
    # Shapes consistent with the module: state_dim=16, hidden=64, latent=32,
    # discrete=4, continuous=2.  batch=256 with block_batch=128 exercises a
    # 2-step batch grid (parallel across TCs on v7x).
    batch, state_dim, hidden_dim = 256, 16, 64
    discrete_dim, continuous_dim = 4, 2
    out_dim = discrete_dim + continuous_dim

    key = jax.random.PRNGKey(0)
    k_x, k_p = jax.random.split(key)
    x = jax.random.normal(k_x, (batch, state_dim), jnp.float32)
    params = init_actor_params(k_p, state_dim, discrete_dim, continuous_dim, hidden_dim)
    packed, packed_out_dim = pack_actor_params(params)
    assert packed_out_dim == out_dim

    out = actor_forward(x, packed, out_dim, block_batch=128)
    out = jax.block_until_ready(out)

    ref = actor_ref(x, params)
    assert out.shape == (batch, out_dim)
    assert jnp.allclose(out, ref, atol=1e-4, rtol=1e-4), float(jnp.max(jnp.abs(out - ref)))

    print("KERNEL_OK")
</pallas_src>

<mosaic_0001>
module attributes {stable_mosaic.version = 11 : i64} {
  func.func @actor_kernel(%arg0: i32, %arg1: memref<128x16xf32, #tpu.memory_space<vmem>>, %arg2: memref<16x128xf32, #tpu.memory_space<vmem>>, %arg3: memref<128x128xf32, #tpu.memory_space<vmem>>, %arg4: memref<128x128xf32, #tpu.memory_space<vmem>>, %arg5: memref<3x128xf32, #tpu.memory_space<vmem>>, %arg6: memref<128x128xf32, #tpu.memory_space<vmem>>) attributes {dimension_semantics = [#tpu.dimension_semantics<parallel>], iteration_bounds = array<i64: 2>, scalar_prefetch = 0 : i64, scratch_operands = 0 : i64, tpu.core_type = #tpu.core_type<tc>, window_params = [{transform_indices = @transform_0, window_bounds = array<i64: 128, 16>}, {pipeline_mode = #tpu.pipeline_mode<synchronous>, transform_indices = @transform_1, window_bounds = array<i64: 16, 128>}, {pipeline_mode = #tpu.pipeline_mode<synchronous>, transform_indices = @transform_2, window_bounds = array<i64: 128, 128>}, {pipeline_mode = #tpu.pipeline_mode<synchronous>, transform_indices = @transform_3, window_bounds = array<i64: 128, 128>}, {pipeline_mode = #tpu.pipeline_mode<synchronous>, transform_indices = @transform_4, window_bounds = array<i64: 3, 128>}, {transform_indices = @transform_5, window_bounds = array<i64: 128, 128>}]} {
    %c0 = arith.constant 0 : index
    %c0_0 = arith.constant 0 : index
    %0 = vector.load %arg1[%c0, %c0_0] : memref<128x16xf32, #tpu.memory_space<vmem>>, vector<128x16xf32>
    %c0_1 = arith.constant 0 : index
    %c0_2 = arith.constant 0 : index
    %1 = vector.load %arg2[%c0_1, %c0_2] : memref<16x128xf32, #tpu.memory_space<vmem>>, vector<16x128xf32>
    %cst = arith.constant dense<0.000000e+00> : vector<128x128xf32>
    %2 = tpu.matmul %0, %1, %cst {dimension_numbers = #tpu.dot_dimension_numbers<[1], [0], [0], [1], [0, 0, 1, 1], [], []>} : vector<128x16xf32>, vector<16x128xf32>, vector<128x128xf32> -> vector<128x128xf32>
    %c0_3 = arith.constant 0 : index
    %c0_4 = arith.constant 0 : index
    %3 = vector.load %arg5[%c0_3, %c0_4] : memref<3x128xf32, #tpu.memory_space<vmem>>, vector<1x128xf32>
    %4 = vector.broadcast %3 : vector<1x128xf32> to vector<128x128xf32>
    %5 = arith.addf %2, %4 : vector<128x128xf32>
    %cst_5 = arith.constant 0.000000e+00 : f32
    %6 = vector.broadcast %cst_5 : f32 to vector<128x128xf32>
    %7 = arith.cmpf ogt, %5, %6 : vector<128x128xf32>
    %cst_6 = arith.constant 0.00999999977 : f32
    %8 = vector.broadcast %cst_6 : f32 to vector<128x128xf32>
    %9 = arith.mulf %8, %5 : vector<128x128xf32>
    %10 = arith.select %7, %5, %9 : vector<128x128xi1>, vector<128x128xf32>
    %c0_7 = arith.constant 0 : index
    %c0_8 = arith.constant 0 : index
    %11 = vector.load %arg3[%c0_7, %c0_8] : memref<128x128xf32, #tpu.memory_space<vmem>>, vector<128x128xf32>
    %cst_9 = arith.constant dense<0.000000e+00> : vector<128x128xf32>
    %12 = tpu.matmul %10, %11, %cst_9 {dimension_numbers = #tpu.dot_dimension_numbers<[1], [0], [0], [1], [0, 0, 1, 1], [], []>} : vector<128x128xf32>, vector<128x128xf32>, vector<128x128xf32> -> vector<128x128xf32>
    %c1 = arith.constant 1 : index
    %c0_10 = arith.constant 0 : index
    %13 = vector.load %arg5[%c1, %c0_10] : memref<3x128xf32, #tpu.memory_space<vmem>>, vector<1x128xf32>
    %14 = vector.broadcast %13 : vector<1x128xf32> to vector<128x128xf32>
    %15 = arith.addf %12, %14 : vector<128x128xf32>
    %cst_11 = arith.constant 0.000000e+00 : f32
    %16 = vector.broadcast %cst_11 : f32 to vector<128x128xf32>
    %17 = arith.cmpf ogt, %15, %16 : vector<128x128xf32>
    %cst_12 = arith.constant 0.00999999977 : f32
    %18 = vector.broadcast %cst_12 : f32 to vector<128x128xf32>
    %19 = arith.mulf %18, %15 : vector<128x128xf32>
    %20 = arith.select %17, %15, %19 : vector<128x128xi1>, vector<128x128xf32>
    %c0_13 = arith.constant 0 : index
    %c0_14 = arith.constant 0 : index
    %21 = vector.load %arg4[%c0_13, %c0_14] : memref<128x128xf32, #tpu.memory_space<vmem>>, vector<128x128xf32>
    %cst_15 = arith.constant dense<0.000000e+00> : vector<128x128xf32>
    %22 = tpu.matmul %20, %21, %cst_15 {dimension_numbers = #tpu.dot_dimension_numbers<[1], [0], [0], [1], [0, 0, 1, 1], [], []>} : vector<128x128xf32>, vector<128x128xf32>, vector<128x128xf32> -> vector<128x128xf32>
    %c2 = arith.constant 2 : index
    %c0_16 = arith.constant 0 : index
    %23 = vector.load %arg5[%c2, %c0_16] : memref<3x128xf32, #tpu.memory_space<vmem>>, vector<1x128xf32>
    %24 = vector.broadcast %23 : vector<1x128xf32> to vector<128x128xf32>
    %25 = arith.addf %22, %24 : vector<128x128xf32>
    %c0_17 = arith.constant 0 : index
    %c0_18 = arith.constant 0 : index
    %26 = vector.load %arg6[%c0_17, %c0_18] : memref<128x128xf32, #tpu.memory_space<vmem>>, vector<128x128xf32>
    tpu.vector_store %arg6[%c0_17, %c0_18], %25 {strides = array<i32>} : memref<128x128xf32, #tpu.memory_space<vmem>>, vector<128x128xf32>,
    return
  }
  func.func @transform_0(%arg0: i32) -> (i32, i32) {
    %c0_i32 = arith.constant 0 : i32
    %c0_i32_0 = arith.constant 0 : i32
    return %arg0, %c0_i32 : i32, i32
  }
  func.func @transform_1(%arg0: i32) -> (i32, i32) {
    %c0_i32 = arith.constant 0 : i32
    %c0_i32_0 = arith.constant 0 : i32
    %c0_i32_1 = arith.constant 0 : i32
    return %c0_i32, %c0_i32_0 : i32, i32
  }
  func.func @transform_2(%arg0: i32) -> (i32, i32) {
    %c0_i32 = arith.constant 0 : i32
    %c0_i32_0 = arith.constant 0 : i32
    %c0_i32_1 = arith.constant 0 : i32
    return %c0_i32, %c0_i32_0 : i32, i32
  }
  func.func @transform_3(%arg0: i32) -> (i32, i32) {
    %c0_i32 = arith.constant 0 : i32
    %c0_i32_0 = arith.constant 0 : i32
    %c0_i32_1 = arith.constant 0 : i32
    return %c0_i32, %c0_i32_0 : i32, i32
  }
  func.func @transform_4(%arg0: i32) -> (i32, i32) {
    %c0_i32 = arith.constant 0 : i32
    %c0_i32_0 = arith.constant 0 : i32
    %c0_i32_1 = arith.constant 0 : i32
    return %c0_i32, %c0_i32_0 : i32, i32
  }
  func.func @transform_5(%arg0: i32) -> (i32, i32) {
    %c0_i32 = arith.constant 0 : i32
    %c0_i32_0 = arith.constant 0 : i32
    return %arg0, %c0_i32 : i32, i32
  }
}

</mosaic_0001>

<bundles_post_ra>
// kernel: tpu_custom_call.1
= control target key start
LH: loop header
LB: loop body
LE: loop exit
PB: predicated region body
PF: predicated region fallthrough
CT: control target
= control target key end

     0   :  { %10 = vsyncpa [#allocation3], 0  ;;  %s1658_s0 = inlined_call_operand.vmem [shape: f32[256,16], index: 0, kind: input, shape index: {}]   ;;  %s1659_s1 = inlined_call_operand.vmem [shape: f32[16,128], index: 1, kind: input, shape index: {}]   ;;  %s1660_s2 = inlined_call_operand.vmem [shape: f32[128,128], index: 2, kind: input, shape index: {}]   ;;  %s1661_s3 = inlined_call_operand.vmem [shape: f32[128,128], index: 3, kind: input, shape index: {}]   ;;  %s1662_s4 = inlined_call_operand.vmem [shape: f32[3,128], index: 4, kind: input, shape index: {}]   ;;  %s1663_s5 = inlined_call_operand.hbm [shape: f32[256,128], index: 5, kind: output, shape index: {}]  }
   0x1   :  { %12 = vsyncpa [#allocation3 + $0x1], 0  ;;  %s1353_s18 = smov 0   ;;  %s1355_s19 = smov 0  }
   0x2   :  { %s1357_s20 = smov 0   ;;  %s1359_s21 = smov 0  }
   0x3 LB: > { %s1374_s22 = sadd.s32 4294967295, %s1318_s21   ;;  %s963_s23 = sadd.s32 4294967294, %s1318_s21   ;;  %s1318_s21 = sphi %s1359_s21, %s1669_s21   ;;  %s1314_s20 = sphi %s1357_s20, %s1668_s20   ;;  %s1310_s19 = sphi %s1355_s19, %s1667_s19   ;;  %s1306_s18 = sphi %s1353_s18, %s1666_s18  }
   0x4   : > { %s1378_s24 = sadd.s32 1, %s1318_s21   ;;  %s135_s25 = sadd.s32 1, %s1314_s20 }
   0x5   : > { %s132_s26 = ssub.s32 %s1318_s21, %s1378_s24  ;;  %p145_p0 = scmp.ne.s32.totalorder %s1314_s20, %s1310_s19 }
   0x6   : > { %p133_p1 = scmp.eq.s32.totalorder %s132_s26, 0  ;;  %p146_p2 = scmp.eq.s32.totalorder %s1374_s22, 1 }
   0x7   : > { %p151_p3 = scmp.ne.s32.totalorder %s1310_s19, %s1306_s18  ;;  %p152_p4 = scmp.eq.s32.totalorder %s963_s23, 1 }
   0x8   : > { %s1389_s27 = scalar_select %p133_p1, %s1314_s20, %s135_s25  }
   0x9   : > { %p1391_p5 = por %p146_p2, %p145_p0  ;;  %p1395_p6 = por %p152_p4, %p151_p3 }
   0xa   : > { %p966_p7 = scmp.ge.s32.totalorder %s1318_s21, 1  ;;  %p191_p8 = scmp.lt.s32.totalorder %s1318_s21, 3 }
   0xc   : > { %p192_p9 = pnand %p966_p7, %p191_p8 }
   0xd   : > { %s968_s9 = sshll.u32 (!%p192_p9), %s1374_s22, 4  ;;  %s994_s8 = sshll.u32 (!%p192_p9), %s1374_s22, 11 }
   0xe   : > { %195 = sbr.rel (%p192_p9) target bundleno = 666 (0x29a), region = 40  ;;  %p220_p10 = scmp.lt.s32.totalorder (!%p192_p9), %s968_s9, 31 }
   0xf   : > { %s1610_s12 = scalar_lea.hbm (!%p192_p9), %s1663_s5, %s994_s8  ;;  %s1320_s13 = smov (!%p192_p9), [#allocation2]  }
  0x10   : > { %s1262_s14 = sshll.u32 (!%p192_p9), %s1320_s13, 4  ;;  %s1263_s14 = int_to_ptr.vmem [resolvable:$false] %s1262_s14 }
  0x11   : > { %s1264_s15 = scalar_lea.vmem (!%p192_p9), %s1263_s14, 4096 }
  0x13   : > { %v243_v0 = vld [vmem:[%s1659_s1 + $0x8] sm:$0xff]  ;;  %v242_v1 = vld [vmem:[%s1659_s1] sm:$0xff]  ;;  %v506_v2 = vld [vmem:[%s1660_s2 + $0x78] sm:$0xff]  ;;  %s1671_s9 = smov (!%p220_p10, %s968_s9), 31  ;;  %vm249_vm0 = vcmask 130048  }
  0x14   : > { %1077 = vmatprep.subr.mxu0 %v243_v0  ;;  %1105 = vmatprep.subr.mxu1 %v506_v2  ;;  %v505_v3 = vld [vmem:[%s1660_s2 + $0x70] sm:$0xff]  ;;  %v504_v4 = vld [vmem:[%s1660_s2 + $0x68] sm:$0xff]  ;;  %v503_v5 = vld [vmem:[%s1660_s2 + $0x60] sm:$0xff]  ;;  %s969_s23 = sshll.u32 %s1671_s9, 3 }
  0x15   : > { %1078 = vmatpush3.msra.mxu0 %v243_v0  ;;  %1106 = vmatpush3.msra.mxu1 %v506_v2  ;;  %s1423_s30 = scalar_lea.vmem %s1658_s0, %s969_s23  ;;  %v502_v6 = vld [vmem:[%s1660_s2 + $0x58] sm:$0xff]  ;;  %v501_v10 = vld [vmem:[%s1660_s2 + $0x50] sm:$0xff]  ;;  %v500_v12 = vld [vmem:[%s1660_s2 + $0x48] sm:$0xff]  ;;  %s216_s23 = sand.u32 1, %s1310_s19  }
  0x16   : > { %1079 = vmatprep.subr.mxu0 %v242_v1  ;;  %1107 = vmatprep.subr.mxu1 %v505_v3  ;;  %v226_v7 = vld [vmem:[%s1423_s30] sm:$0xff]  ;;  %v227_v8 = vld [vmem:[%s1423_s30 + $0x8] sm:$0xff]  ;;  %v228_v9 = vld [vmem:[%s1423_s30 + $0x10] sm:$0xff]  ;;  %s967_s25 = sshll.u32 %s216_s23, 7  ;;  %s1618_s22 = scalar_lea.sflag [#allocation3], %s216_s23 }
  0x17   : > { %1080 = vmatpush3.msra.mxu0 %v242_v1  ;;  %1108 = vmatpush3.msra.mxu1 %v505_v3  ;;  %v229_v11 = vld [vmem:[%s1423_s30 + $0x18] sm:$0xff]  ;;  %v230_v13 = vld [vmem:[%s1423_s30 + $0x20] sm:$0xff]  ;;  %v231_v15 = vld [vmem:[%s1423_s30 + $0x28] sm:$0xff]  ;;  %s1589_s7 = scalar_lea.vmem [#allocation2], %s967_s25 }
  0x18   : > { %1109 = vmatprep.subr.mxu1 %v504_v4  ;;  %1081 = vmatprep.mubr.msk.f32.mxu0 %vm249_vm0, %v226_v7  ;;  %v499_v14 = vld [vmem:[%s1660_s2 + $0x40] sm:$0xff]  ;;  %v498_v16 = vld [vmem:[%s1660_s2 + $0x38] sm:$0xff]  ;;  %v232_v17 = vld [vmem:[%s1423_s30 + $0x30] sm:$0xff]  ;;  %s901_s9 = sshll.u32 %s1589_s7, 4  ;;  %s1612_s9 = int_to_ptr.vmem [resolvable:$true] %s901_s9 }
  0x19   : > { %1110 = vmatpush3.msra.mxu1 %v504_v4  ;;  %1082 = vmatmul.mubr.msk.f32.vlgmr.msra.gmra.mxu0 %vm249_vm0, %v227_v8  ;;  %v497_v18 = vld [vmem:[%s1660_s2 + $0x30] sm:$0xff]  ;;  %v233_v19 = vld [vmem:[%s1423_s30 + $0x38] sm:$0xff]  ;;  %v496_v20 = vld [vmem:[%s1660_s2 + $0x28] sm:$0xff]  ;;  %p1265_p0 = scmp.lt.s32.totalorder %s1612_s9, %s1263_s14 }
  0x1a   : > { %1111 = vmatprep.subr.mxu1 %v503_v5  ;;  %1084 = vmatprep.mubr.msk.f32.mxu0 %vm249_vm0, %v228_v9  ;;  %v234_v21 = vld [vmem:[%s1423_s30 + $0x40] sm:$0xff]  ;;  %v235_v23 = vld [vmem:[%s1423_s30 + $0x48] sm:$0xff]  ;;  %v236_v24 = vld [vmem:[%s1423_s30 + $0x50] sm:$0xff] }
  0x1b   : > { %1112 = vmatpush3.msra.mxu1 %v503_v5  ;;  %v495_v22 = vld [vmem:[%s1660_s2 + $0x20] sm:$0xff]  ;;  %v237_v25 = vld [vmem:[%s1423_s30 + $0x58] sm:$0xff]  ;;  %v239_v27 = vld [vmem:[%s1423_s30 + $0x68] sm:$0xff] }
  0x1c   : > { %1113 = vmatprep.subr.mxu1 %v502_v6  ;;  %v238_v26 = vld [vmem:[%s1423_s30 + $0x60] sm:$0xff]  ;;  %v240_v28 = vld [vmem:[%s1423_s30 + $0x70] sm:$0xff]  ;;  %v241_v29 = vld [vmem:[%s1423_s30 + $0x78] sm:$0xff]  ;;  %s1258_s30 = scalar_lea.vmem %s1612_s9, 2048 }
  0x1d   : > { %1114 = vmatpush3.msra.mxu1 %v502_v6  ;;  %1085 = vmatmul.mubr.msk.f32.gmra.mxu0 %vm249_vm0, %v229_v11  ;;  %v494_v30 = vld [vmem:[%s1660_s2 + $0x18] sm:$0xff]  ;;  %v493_v31 = vld [vmem:[%s1660_s2 + $0x10] sm:$0xff]  ;;  %v492_v32 = vld [vmem:[%s1660_s2 + $0x8] sm:$0xff]  ;;  %p1259_p11 = scmp.ne.s32.totalorder %s1612_s9, %s1258_s30  ;;  %p1266_p1 = scmp.lt.s32.totalorder %s1264_s15, %s1258_s30 }
  0x1e   : > { %1115 = vmatprep.subr.mxu1 %v501_v10  ;;  %1087 = vmatprep.mubr.msk.f32.mxu0 %vm249_vm0, %v230_v13  ;;  %v491_v33 = vld [vmem:[%s1660_s2] sm:$0xff]  ;;  %v720_v34 = vld [vmem:[%s1661_s3 + $0x78] sm:$0xff]  ;;  %v719_v35 = vld [vmem:[%s1661_s3 + $0x70] sm:$0xff] }
  0x1f   : > { %1116 = vmatpush3.msra.mxu1 %v501_v10  ;;  %1161 = vmatprep.subr.mxu0 %v720_v34  ;;  %v718_v36 = vld [vmem:[%s1661_s3 + $0x68] sm:$0xff]  ;;  %v717_v37 = vld [vmem:[%s1661_s3 + $0x60] sm:$0xff]  ;;  %v716_v38 = vld [vmem:[%s1661_s3 + $0x58] sm:$0xff]  ;;  %p1260_p12 = pnand %p1259_p11, %p1391_p5  ;;  %p1267_p2 = por %p1266_p1, %p1265_p0 }
  0x20   : > { %1117 = vmatprep.subr.mxu1 %v500_v12  ;;  %1162 = vmatpush3.msra.mxu0 %v720_v34  ;;  %v715_v39 = vld [vmem:[%s1661_s3 + $0x50] sm:$0xff]  ;;  %v714_v40 = vld [vmem:[%s1661_s3 + $0x48] sm:$0xff]  ;;  %v713_v41 = vld [vmem:[%s1661_s3 + $0x40] sm:$0xff] }
  0x21   : > { %1118 = vmatpush3.msra.mxu1 %v500_v12  ;;  %1088 = vmatmul.mubr.msk.f32.gmra.mxu0 %vm249_vm0, %v231_v15  ;;  %v712_v42 = vld [vmem:[%s1661_s3 + $0x38] sm:$0xff]  ;;  %v711_v43 = vld [vmem:[%s1661_s3 + $0x30] sm:$0xff]  ;;  %v710_v44 = vld [vmem:[%s1661_s3 + $0x28] sm:$0xff]  ;;  %p1261_p13 = pneg %p1260_p12 }
  0x22   : > { %1119 = vmatprep.subr.mxu1 %v499_v14  ;;  %1090 = vmatprep.mubr.msk.f32.mxu0 %vm249_vm0, %v232_v17  ;;  %v709_v45 = vld [vmem:[%s1661_s3 + $0x20] sm:$0xff] }
  0x23   : > { %1120 = vmatpush3.msra.mxu1 %v499_v14  ;;  %1163 = vmatprep.subr.mxu0 %v719_v35  ;;  %v1532_v46 = vld [vmem:[%s1662_s4] ss:$0 sm:$0xff]  ;;  %p1268_p3 = pnand %p1267_p2, %p1261_p13 }
  0x24   : > { %1121 = vmatprep.subr.mxu1 %v498_v16  ;;  %1164 = vmatpush3.msra.mxu0 %v719_v35 }
  0x25   : > { %1122 = vmatpush3.msra.mxu1 %v498_v16  ;;  %1091 = vmatmul.mubr.msk.f32.gmra.mxu0 %vm249_vm0, %v233_v19 }
  0x26   : > { %1123 = vmatprep.subr.mxu1 %v497_v18  ;;  %1093 = vmatprep.mubr.msk.f32.mxu0 %vm249_vm0, %v234_v21 }
  0x27   : > { %1124 = vmatpush3.msra.mxu1 %v497_v18  ;;  %1165 = vmatprep.subr.mxu0 %v718_v36 }
  0x28   : > { %1125 = vmatprep.subr.mxu1 %v496_v20  ;;  %1166 = vmatpush3.msra.mxu0 %v718_v36 }
  0x29   : > { %1126 = vmatpush3.msra.mxu1 %v496_v20  ;;  %1094 = vmatmul.mubr.msk.f32.gmra.mxu0 %vm249_vm0, %v235_v23 }
  0x2a   : > { %1127 = vmatprep.subr.mxu1 %v495_v22  ;;  %1096 = vmatprep.mubr.msk.f32.mxu0 %vm249_vm0, %v236_v24 }
  0x2b   : > { %1128 = vmatpush3.msra.mxu1 %v495_v22  ;;  %1167 = vmatprep.subr.mxu0 %v717_v37 }
  0x2c   : > { %1129 = vmatprep.subr.mxu1 %v494_v30  ;;  %1168 = vmatpush3.msra.mxu0 %v717_v37 }
  0x2d   : > { %1097 = vmatmul.mubr.msk.f32.gmra.mxu0 %vm249_vm0, %v237_v25  ;;  %1130 = vmatpush3.msra.mxu1 %v494_v30 }
  0x2e   : > { %1099 = vmatprep.mubr.msk.f32.mxu0 %vm249_vm0, %v238_v26  ;;  %1131 = vmatprep.subr.mxu1 %v493_v31 }
  0x2f   : > { %1132 = vmatpush3.msra.mxu1 %v493_v31  ;;  %1169 = vmatprep.subr.mxu0 %v716_v38 }
  0x30   : > { %1133 = vmatprep.subr.mxu1 %v492_v32  ;;  %1170 = vmatpush3.msra.mxu0 %v716_v38 }
  0x31   : > { %1100 = vmatmul.mubr.msk.f32.gmra.mxu0 %vm249_vm0, %v239_v27  ;;  %1134 = vmatpush3.msra.mxu1 %v492_v32 }
  0x32   : > { %1102 = vmatprep.mubr.msk.f32.mxu0 %vm249_vm0, %v240_v28  ;;  %1135 = vmatprep.subr.mxu1 %v491_v33 }
  0x33   : > { %1136 = vmatpush3.msra.mxu1 %v491_v33  ;;  %1171 = vmatprep.subr.mxu0 %v715_v39 }
  0x34   : > { %1172 = vmatpush3.msra.mxu0 %v715_v39 }
  0x35   : > { %1103 = vmatmul.mubr.msk.f32.gmra.mxu0 %vm249_vm0, %v241_v29  ;;  %1173 = vmatprep.subr.mxu0 %v714_v40 }
  0x36   : > { %1174 = vmatpush3.msra.mxu0 %v714_v40 }
  0x37   : > { %1175 = vmatprep.subr.mxu0 %v713_v41 }
  0x38   : > { %1176 = vmatpush3.msra.mxu0 %v713_v41 }
  0x39   : > { %1177 = vmatprep.subr.mxu0 %v712_v42 }
  0x3a   : > { %1178 = vmatpush3.msra.mxu0 %v712_v42 }
  0x3b   : > { %1179 = vmatprep.subr.mxu0 %v711_v43 }
  0x3c   : > { %1180 = vmatpush3.msra.mxu0 %v711_v43 }
  0x3d   : > { %1181 = vmatprep.subr.mxu0 %v710_v44 }
  0x3e   : > { %1182 = vmatpush3.msra.mxu0 %v710_v44 }
  0x3f   : > { %1183 = vmatprep.subr.mxu0 %v709_v45 }
  0x40   : > { %1184 = vmatpush3.msra.mxu0 %v709_v45 }
  0xd9   : > { %v1083_v47 = vpop.f32.mrf.mxu0 }
  0xda   : > { %v370_v48 = vadd.f32 %v1083_v47, %v1532_v46 }
  0xdb   : > { %v364_v49 = vpop.f32.mrf.mxu0 }
  0xdc   : > { %v365_v50 = vadd.f32 %v1532_v46, %v364_v49  ;;  %v460_v51 = vmul.f32 0.01, %v370_v48  ;;  %vm444_vm2 = vcmp.gt.f32.partialorder %v370_v48, 0.0  ;;  %v706_v49 = vld [vmem:[%s1661_s3 + $0x8] sm:$0xff] }
  0xdd   : > { %v1086_v52 = vpop.f32.mrf.mxu0 }
  0xde   : > { %v380_v53 = vadd.f32 %v1086_v52, %v1532_v46  ;;  %vm443_vm1 = vcmp.gt.f32.partialorder %v365_v50, 0.0  ;;  %v459_v54 = vmul.f32 0.01, %v365_v50  ;;  %v476_v60 = vsel %vm444_vm2, %v370_v48, %v460_v51  ;;  %v708_v48 = vld [vmem:[%s1661_s3 + $0x18] sm:$0xff]  ;;  %v1565_v51 = vld [vmem:[%s1662_s4 + $0x1] ss:$0 sm:$0xff] }
  0xdf   : > { %v374_v55 = vpop.f32.mrf.mxu0  ;;  %1185 = vmatprep.subr.mxu0 %v708_v48 }
  0xe0   : > { %v375_v56 = vadd.f32 %v1532_v46, %v374_v55  ;;  %v475_v57 = vsel %vm443_vm1, %v365_v50, %v459_v54  ;;  %v462_v58 = vmul.f32 0.01, %v380_v53  ;;  %vm446_vm4 = vcmp.gt.f32.partialorder %v380_v53, 0.0  ;;  %1186 = vmatpush3.msra.mxu0 %v708_v48  ;;  %v705_v50 = vld [vmem:[%s1661_s3] sm:$0xff] }
  0xe1   : > { %v1089_v59 = vpop.f32.mrf.mxu0  ;;  %1137 = vmatprep.mubr.f32.mxu1 %v475_v57 }
  0xe2   : > { %v461_v61 = vmul.f32 0.01, %v375_v56  ;;  %v390_v62 = vadd.f32 %v1089_v59, %v1532_v46  ;;  %1138 = vmatmul.mubr.f32.vlgmr.msra.gmra.mxu1 %v476_v60  ;;  %vm445_vm3 = vcmp.gt.f32.partialorder %v375_v56, 0.0  ;;  %v478_v4 = vsel %vm446_vm4, %v380_v53, %v462_v58 }
  0xe3   : > { %v384_v63 = vpop.f32.mrf.mxu0 }
  0xe4   : > { %v385_v0 = vadd.f32 %v1532_v46, %v384_v63  ;;  %v477_v1 = vsel %vm445_vm3, %v375_v56, %v461_v61  ;;  %v464_v2 = vmul.f32 0.01, %v390_v62  ;;  %vm448_vm6 = vcmp.gt.f32.partialorder %v390_v62, 0.0 }
  0xe5   : > { %v1092_v3 = vpop.f32.mrf.mxu0  ;;  %1140 = vmatprep.mubr.f32.mxu1 %v477_v1 }
  0xe6   : > { %v463_v5 = vmul.f32 0.01, %v385_v0  ;;  %v400_v6 = vadd.f32 %v1092_v3, %v1532_v46  ;;  %1141 = vmatmul.mubr.f32.gmra.mxu1 %v478_v4  ;;  %vm447_vm5 = vcmp.gt.f32.partialorder %v385_v0, 0.0  ;;  %v480_v12 = vsel %vm448_vm6, %v390_v62, %v464_v2 }
  0xe7   : > { %v394_v7 = vpop.f32.mrf.mxu0 }
  0xe8   : > { %v395_v8 = vadd.f32 %v1532_v46, %v394_v7  ;;  %v479_v9 = vsel %vm447_vm5, %v385_v0, %v463_v5  ;;  %v466_v10 = vmul.f32 0.01, %v400_v6  ;;  %vm450_vm8 = vcmp.gt.f32.partialorder %v400_v6, 0.0 }
  0xe9   : > { %v1095_v11 = vpop.f32.mrf.mxu0  ;;  %1143 = vmatprep.mubr.f32.mxu1 %v479_v9 }
  0xea   : > { %v465_v13 = vmul.f32 0.01, %v395_v8  ;;  %v410_v14 = vadd.f32 %v1095_v11, %v1532_v46  ;;  %1144 = vmatmul.mubr.f32.gmra.mxu1 %v480_v12  ;;  %vm449_vm7 = vcmp.gt.f32.partialorder %v395_v8, 0.0  ;;  %v482_v20 = vsel %vm450_vm8, %v400_v6, %v466_v10 }
  0xeb   : > { %v404_v15 = vpop.f32.mrf.mxu0 }
  0xec   : > { %v405_v16 = vadd.f32 %v1532_v46, %v404_v15  ;;  %v481_v17 = vsel %vm449_vm7, %v395_v8, %v465_v13  ;;  %v468_v18 = vmul.f32 0.01, %v410_v14  ;;  %vm452_vm10 = vcmp.gt.f32.partialorder %v410_v14, 0.0 }
  0xed   : > { %v1098_v19 = vpop.f32.mrf.mxu0  ;;  %1146 = vmatprep.mubr.f32.mxu1 %v481_v17 }
  0xee   : > { %v467_v21 = vmul.f32 0.01, %v405_v16  ;;  %v420_v22 = vadd.f32 %v1098_v19, %v1532_v46  ;;  %1147 = vmatmul.mubr.f32.gmra.mxu1 %v482_v20  ;;  %vm451_vm9 = vcmp.gt.f32.partialorder %v405_v16, 0.0  ;;  %v484_v28 = vsel %vm452_vm10, %v410_v14, %v468_v18 }
  0xef   : > { %v414_v23 = vpop.f32.mrf.mxu0 }
  0xf0   : > { %v415_v24 = vadd.f32 %v1532_v46, %v414_v23  ;;  %v483_v25 = vsel %vm451_vm9, %v405_v16, %v467_v21  ;;  %v470_v26 = vmul.f32 0.01, %v420_v22  ;;  %vm454_vm12 = vcmp.gt.f32.partialorder %v420_v22, 0.0 }
  0xf1   : > { %v1101_v27 = vpop.f32.mrf.mxu0  ;;  %1149 = vmatprep.mubr.f32.mxu1 %v483_v25 }
  0xf2   : > { %v469_v29 = vmul.f32 0.01, %v415_v24  ;;  %v430_v30 = vadd.f32 %v1101_v27, %v1532_v46  ;;  %1150 = vmatmul.mubr.f32.gmra.mxu1 %v484_v28  ;;  %vm453_vm11 = vcmp.gt.f32.partialorder %v415_v24, 0.0  ;;  %v486_v36 = vsel %vm454_vm12, %v420_v22, %v470_v26 }
  0xf3   : > { %v424_v31 = vpop.f32.mrf.mxu0 }
  0xf4   : > { %v425_v32 = vadd.f32 %v1532_v46, %v424_v31  ;;  %v485_v33 = vsel %vm453_vm11, %v415_v24, %v469_v29  ;;  %v472_v34 = vmul.f32 0.01, %v430_v30  ;;  %vm456_vm14 = vcmp.gt.f32.partialorder %v430_v30, 0.0 }
  0xf5   : > { %v1104_v35 = vpop.f32.mrf.mxu0  ;;  %1152 = vmatprep.mubr.f32.mxu1 %v485_v33 }
  0xf6   : > { %v471_v37 = vmul.f32 0.01, %v425_v32  ;;  %v440_v38 = vadd.f32 %v1104_v35, %v1532_v46  ;;  %1153 = vmatmul.mubr.f32.gmra.mxu1 %v486_v36  ;;  %vm455_vm13 = vcmp.gt.f32.partialorder %v425_v32, 0.0  ;;  %v488_v43 = vsel %vm456_vm14, %v430_v30, %v472_v34 }
  0xf7   : > { %v434_v39 = vpop.f32.mrf.mxu0 }
  0xf8   : > { %v435_v40 = vadd.f32 %v1532_v46, %v434_v39  ;;  %v487_v41 = vsel %vm455_vm13, %v425_v32, %v471_v37  ;;  %v474_v42 = vmul.f32 0.01, %v440_v38  ;;  %vm458_vm0 = vcmp.gt.f32.partialorder %v440_v38, 0.0  ;;  %v707_v46 = vld [vmem:[%s1661_s3 + $0x10] sm:$0xff] }
  0xf9   : > { %1155 = vmatprep.mubr.f32.mxu1 %v487_v41  ;;  %1187 = vmatprep.subr.mxu0 %v707_v46 }
  0xfa   : > { %v473_v44 = vmul.f32 0.01, %v435_v40  ;;  %1156 = vmatmul.mubr.f32.gmra.mxu1 %v488_v43  ;;  %vm457_vm15 = vcmp.gt.f32.partialorder %v435_v40, 0.0  ;;  %v490_v47 = vsel %vm458_vm0, %v440_v38, %v474_v42  ;;  %1188 = vmatpush3.msra.mxu0 %v707_v46 }
  0xfb   : > { %1189 = vmatprep.subr.mxu0 %v706_v49 }
  0xfc   : > { %v489_v45 = vsel %vm457_vm15, %v435_v40, %v473_v44  ;;  %1190 = vmatpush3.msra.mxu0 %v706_v49 }
  0xfd   : > { %1158 = vmatprep.mubr.f32.mxu1 %v489_v45  ;;  %1191 = vmatprep.subr.mxu0 %v705_v50 }
  0xfe   : > { %1159 = vmatmul.mubr.f32.gmra.mxu1 %v490_v47  ;;  %1192 = vmatpush3.msra.mxu0 %v705_v50 }
 0x1a2   : > { %v1139_v52 = vpop.f32.mrf.mxu1 }
 0x1a3   : > { %v584_v53 = vadd.f32 %v1139_v52, %v1565_v51 }
 0x1a4   : > { %v578_v54 = vpop.f32.mrf.mxu1 }
 0x1a5   : > { %v579_v55 = vadd.f32 %v1565_v51, %v578_v54  ;;  %v674_v56 = vmul.f32 0.01, %v584_v53  ;;  %vm658_vm1 = vcmp.gt.f32.partialorder %v584_v53, 0.0 }
 0x1a6   : > { %v1142_v57 = vpop.f32.mrf.mxu1 }
 0x1a7   : > { %v673_v58 = vmul.f32 0.01, %v579_v55  ;;  %v594_v59 = vadd.f32 %v1142_v57, %v1565_v51  ;;  %vm657_vm2 = vcmp.gt.f32.partialorder %v579_v55, 0.0  ;;  %v690_v63 = vsel %vm658_vm1, %v584_v53, %v674_v56  ;;  %v988_v53 = vld [vmem:[%s1662_s4 + $0x2] ss:$0 sm:$0xff] }
 0x1a8   : > { %v588_v60 = vpop.f32.mrf.mxu1 }
 0x1a9   : > { %v589_v61 = vadd.f32 %v1565_v51, %v588_v60  ;;  %v689_v62 = vsel %vm657_vm2, %v579_v55, %v673_v58  ;;  %v676_v0 = vmul.f32 0.01, %v594_v59  ;;  %vm660_vm4 = vcmp.gt.f32.partialorder %v594_v59, 0.0 }
 0x1aa   : > { %v1145_v1 = vpop.f32.mrf.mxu1  ;;  %1193 = vmatprep.mubr.f32.mxu0 %v689_v62 }
 0x1ab   : > { %v675_v2 = vmul.f32 0.01, %v589_v61  ;;  %v604_v3 = vadd.f32 %v1145_v1, %v1565_v51  ;;  %1194 = vmatmul.mubr.f32.vlgmr.msra.gmra.mxu0 %v690_v63  ;;  %vm659_vm3 = vcmp.gt.f32.partialorder %v589_v61, 0.0  ;;  %v692_v9 = vsel %vm660_vm4, %v594_v59, %v676_v0 }
 0x1ac   : > { %v598_v4 = vpop.f32.mrf.mxu1 }
 0x1ad   : > { %v599_v5 = vadd.f32 %v1565_v51, %v598_v4  ;;  %v691_v6 = vsel %vm659_vm3, %v589_v61, %v675_v2  ;;  %v678_v7 = vmul.f32 0.01, %v604_v3  ;;  %vm662_vm6 = vcmp.gt.f32.partialorder %v604_v3, 0.0 }
 0x1ae   : > { %v1148_v8 = vpop.f32.mrf.mxu1  ;;  %1196 = vmatprep.mubr.f32.mxu0 %v691_v6 }
 0x1af   : > { %v677_v10 = vmul.f32 0.01, %v599_v5  ;;  %v614_v11 = vadd.f32 %v1148_v8, %v1565_v51  ;;  %1197 = vmatmul.mubr.f32.gmra.mxu0 %v692_v9  ;;  %vm661_vm5 = vcmp.gt.f32.partialorder %v599_v5, 0.0  ;;  %v694_v17 = vsel %vm662_vm6, %v604_v3, %v678_v7 }
 0x1b0   : > { %v608_v12 = vpop.f32.mrf.mxu1 }
 0x1b1   : > { %v609_v13 = vadd.f32 %v1565_v51, %v608_v12  ;;  %v693_v14 = vsel %vm661_vm5, %v599_v5, %v677_v10  ;;  %v680_v15 = vmul.f32 0.01, %v614_v11  ;;  %vm664_vm8 = vcmp.gt.f32.partialorder %v614_v11, 0.0 }
 0x1b2   : > { %v1151_v16 = vpop.f32.mrf.mxu1  ;;  %1199 = vmatprep.mubr.f32.mxu0 %v693_v14 }
 0x1b3   : > { %v679_v18 = vmul.f32 0.01, %v609_v13  ;;  %v624_v19 = vadd.f32 %v1151_v16, %v1565_v51  ;;  %1200 = vmatmul.mubr.f32.gmra.mxu0 %v694_v17  ;;  %vm663_vm7 = vcmp.gt.f32.partialorder %v609_v13, 0.0  ;;  %v696_v25 = vsel %vm664_vm8, %v614_v11, %v680_v15 }
 0x1b4   : > { %v618_v20 = vpop.f32.mrf.mxu1 }
 0x1b5   : > { %v619_v21 = vadd.f32 %v1565_v51, %v618_v20  ;;  %v695_v22 = vsel %vm663_vm7, %v609_v13, %v679_v18  ;;  %v682_v23 = vmul.f32 0.01, %v624_v19  ;;  %vm666_vm10 = vcmp.gt.f32.partialorder %v624_v19, 0.0 }
 0x1b6   : > { %v1154_v24 = vpop.f32.mrf.mxu1  ;;  %1202 = vmatprep.mubr.f32.mxu0 %v695_v22 }
 0x1b7   : > { %v681_v26 = vmul.f32 0.01, %v619_v21  ;;  %v634_v27 = vadd.f32 %v1154_v24, %v1565_v51  ;;  %1203 = vmatmul.mubr.f32.gmra.mxu0 %v696_v25  ;;  %vm665_vm9 = vcmp.gt.f32.partialorder %v619_v21, 0.0  ;;  %v698_v33 = vsel %vm666_vm10, %v624_v19, %v682_v23 }
 0x1b8   : > { %v628_v28 = vpop.f32.mrf.mxu1 }
 0x1b9   : > { %v629_v29 = vadd.f32 %v1565_v51, %v628_v28  ;;  %v697_v30 = vsel %vm665_vm9, %v619_v21, %v681_v26  ;;  %v684_v31 = vmul.f32 0.01, %v634_v27  ;;  %vm668_vm12 = vcmp.gt.f32.partialorder %v634_v27, 0.0 }
 0x1ba   : > { %v1157_v32 = vpop.f32.mrf.mxu1  ;;  %1205 = vmatprep.mubr.f32.mxu0 %v697_v30 }
 0x1bb   : > { %v683_v34 = vmul.f32 0.01, %v629_v29  ;;  %v644_v35 = vadd.f32 %v1157_v32, %v1565_v51  ;;  %1206 = vmatmul.mubr.f32.gmra.mxu0 %v698_v33  ;;  %vm667_vm11 = vcmp.gt.f32.partialorder %v629_v29, 0.0  ;;  %v700_v41 = vsel %vm668_vm12, %v634_v27, %v684_v31 }
 0x1bc   : > { %v638_v36 = vpop.f32.mrf.mxu1 }
 0x1bd   : > { %v639_v37 = vadd.f32 %v1565_v51, %v638_v36  ;;  %v699_v38 = vsel %vm667_vm11, %v629_v29, %v683_v34  ;;  %v686_v39 = vmul.f32 0.01, %v644_v35  ;;  %vm670_vm14 = vcmp.gt.f32.partialorder %v644_v35, 0.0 }
 0x1be   : > { %v1160_v40 = vpop.f32.mrf.mxu1  ;;  %1208 = vmatprep.mubr.f32.mxu0 %v699_v38 }
 0x1bf   : > { %v685_v42 = vmul.f32 0.01, %v639_v37  ;;  %v654_v43 = vadd.f32 %v1160_v40, %v1565_v51  ;;  %1209 = vmatmul.mubr.f32.gmra.mxu0 %v700_v41  ;;  %vm669_vm13 = vcmp.gt.f32.partialorder %v639_v37, 0.0  ;;  %v702_v46 = vsel %vm670_vm14, %v644_v35, %v686_v39 }
 0x1c0   : > { %v648_v44 = vpop.f32.mrf.mxu1 }
 0x1c1   : > { %v649_v45 = vadd.f32 %v1565_v51, %v648_v44  ;;  %v701_v47 = vsel %vm669_vm13, %v639_v37, %v685_v42  ;;  %v688_v48 = vmul.f32 0.01, %v654_v43  ;;  %vm672_vm0 = vcmp.gt.f32.partialorder %v654_v43, 0.0 }
 0x1c2   : > { %1211 = vmatprep.mubr.f32.mxu0 %v701_v47 }
 0x1c3   : > { %v687_v49 = vmul.f32 0.01, %v649_v45  ;;  %1212 = vmatmul.mubr.f32.gmra.mxu0 %v702_v46  ;;  %vm671_vm15 = vcmp.gt.f32.partialorder %v649_v45, 0.0  ;;  %v704_v52 = vsel %vm672_vm0, %v654_v43, %v688_v48 }
 0x1c5   : > { %v703_v50 = vsel %vm671_vm15, %v649_v45, %v687_v49 }
 0x1c6   : > { %1214 = vmatprep.mubr.f32.mxu0 %v703_v50 }
 0x1c7   : > { %1215 = vmatmul.mubr.f32.gmra.mxu0 %v704_v52 }
 0x26b   : > { %v1195_v51 = vpop.f32.mrf.mxu0 }
 0x26c   : > { %v798_v54 = vadd.f32 %v1195_v51, %v988_v53 }
 0x26d   : > { %v792_v55 = vpop.f32.mrf.mxu0 }
 0x26e   : > { %872 = vst [vmem:[%s1589_s7 + $0x8] sm:$0xff] %v798_v54  ;;  %v793_v56 = vadd.f32 %v988_v53, %v792_v55 }
 0x26f   : > { %v1198_v57 = vpop.f32.mrf.mxu0 }
 0x270   : > { %871 = vst [vmem:[%s1589_s7] sm:$0xff] %v793_v56  ;;  %v808_v58 = vadd.f32 %v1198_v57, %v988_v53 }
 0x271   : > { %v802_v59 = vpop.f32.mrf.mxu0 }
 0x272   : > { %874 = vst [vmem:[%s1589_s7 + $0x18] sm:$0xff] %v808_v58  ;;  %v803_v60 = vadd.f32 %v988_v53, %v802_v59 }
 0x273   : > { %v1201_v61 = vpop.f32.mrf.mxu0 }
 0x274   : > { %873 = vst [vmem:[%s1589_s7 + $0x10] sm:$0xff] %v803_v60  ;;  %v818_v62 = vadd.f32 %v1201_v61, %v988_v53 }
 0x275   : > { %v812_v63 = vpop.f32.mrf.mxu0 }
 0x276   : > { %876 = vst [vmem:[%s1589_s7 + $0x28] sm:$0xff] %v818_v62  ;;  %v813_v0 = vadd.f32 %v988_v53, %v812_v63 }
 0x277   : > { %v1204_v1 = vpop.f32.mrf.mxu0 }
 0x278   : > { %875 = vst [vmem:[%s1589_s7 + $0x20] sm:$0xff] %v813_v0  ;;  %v828_v2 = vadd.f32 %v1204_v1, %v988_v53 }
 0x279   : > { %v822_v3 = vpop.f32.mrf.mxu0 }
 0x27a   : > { %878 = vst [vmem:[%s1589_s7 + $0x38] sm:$0xff] %v828_v2  ;;  %v823_v4 = vadd.f32 %v988_v53, %v822_v3 }
 0x27b   : > { %v1207_v5 = vpop.f32.mrf.mxu0 }
 0x27c   : > { %877 = vst [vmem:[%s1589_s7 + $0x30] sm:$0xff] %v823_v4  ;;  %v838_v6 = vadd.f32 %v1207_v5, %v988_v53 }
 0x27d   : > { %v832_v7 = vpop.f32.mrf.mxu0 }
 0x27e   : > { %880 = vst [vmem:[%s1589_s7 + $0x48] sm:$0xff] %v838_v6  ;;  %v833_v8 = vadd.f32 %v988_v53, %v832_v7 }
 0x27f   : > { %v1210_v9 = vpop.f32.mrf.mxu0 }
 0x280   : > { %879 = vst [vmem:[%s1589_s7 + $0x40] sm:$0xff] %v833_v8  ;;  %v848_v10 = vadd.f32 %v1210_v9, %v988_v53 }
 0x281   : > { %v842_v11 = vpop.f32.mrf.mxu0 }
 0x282   : > { %882 = vst [vmem:[%s1589_s7 + $0x58] sm:$0xff] %v848_v10  ;;  %v843_v12 = vadd.f32 %v988_v53, %v842_v11 }
 0x283   : > { %v1213_v13 = vpop.f32.mrf.mxu0 }
 0x284   : > { %881 = vst [vmem:[%s1589_s7 + $0x50] sm:$0xff] %v843_v12  ;;  %v858_v14 = vadd.f32 %v1213_v13, %v988_v53 }
 0x285   : > { %v852_v15 = vpop.f32.mrf.mxu0 }
 0x286   : > { %884 = vst [vmem:[%s1589_s7 + $0x68] sm:$0xff] %v858_v14  ;;  %v853_v16 = vadd.f32 %v988_v53, %v852_v15 }
 0x287   : > { %v1216_v17 = vpop.f32.mrf.mxu0 }
 0x288   : > { %883 = vst [vmem:[%s1589_s7 + $0x60] sm:$0xff] %v853_v16  ;;  %v868_v18 = vadd.f32 %v1216_v17, %v988_v53 }
 0x289   : > { %v862_v19 = vpop.f32.mrf.mxu0 }
 0x28a   : > { %886 = vst [vmem:[%s1589_s7 + $0x78] sm:$0xff] %v868_v18  ;;  %v863_v20 = vadd.f32 %v988_v53, %v862_v19 }
 0x28c   : > { %885 = vst [vmem:[%s1589_s7 + $0x70] sm:$0xff] %v863_v20 }
 0x28d   : > { %1271 = shalt.err (!%p1268_p3)
}
 0x28e   : > { %s1272_s16 = scalar_lea.hbm %s1610_s12, 2048  ;;  %s1276_s25 = scalar_lea.hbm %s1663_s5, 4096 }
 0x28f   : > { %p1273_p4 = scmp.ne.s32.totalorder %s1610_s12, %s1272_s16  ;;  %p1277_p9 = scmp.lt.s32.totalorder %s1610_s12, %s1663_s5 }
 0x290   : > { %p1278_p10 = scmp.lt.s32.totalorder %s1276_s25, %s1272_s16 }
 0x291   : > { %p1274_p7 = pnand %p1273_p4, %p1391_p5 }
 0x292   : > { %p1279_p11 = por %p1278_p10, %p1277_p9 }
 0x293   : > { %p1275_p8 = pneg %p1274_p7 }
 0x295   : > { %p1280_p12 = pnand %p1279_p11, %p1275_p8 }
 0x297   : > { %1283 = shalt.err (!%p1280_p12)
}
 0x298   : > { %s1321_s7 = smov 128   ;;  %s1322_s8 = smov 8  }
 0x299   : > { %1217 = dma.vmem_to_hbm [thread:$0]  (%p1391_p5), %s1612_s9, 2048, %s1610_s12, %s1618_s22, %s1321_s7, %s1321_s7, %s1322_s8  }
 0x29a PF: > { %p1223_p13 = scmp.ge.s32.totalorder %s1318_s21, 2  ;;  %s916_s10 = sand.u32 1, %s1306_s18  }
 0x29b   : > { %s917_s11 = scalar_lea.sflag [#allocation3], %s916_s10 }
 0x29c   : > { %p1220_p0 = pnand %p1223_p13, %p1395_p6 }
 0x29e   : > { %p1221_p1 = pneg %p1220_p0 }
 0x2a0   : > { %1301 = dma.done.wait (%p1221_p1), %s917_s11, 2048  }
 0x2a1   : > { %1303 = vsyncadd (%p1221_p1), %s917_s11, 4294965248  ;;  %p15_p2 = scmp.ge.s32.totalorder %s1378_s24, 4   ;;  %s1666_s18 = smov %s1310_s19 }
 0x2a2   : > { %s1667_s19 = smov %s1314_s20  ;;  %s1668_s20 = smov %s1389_s27 }
 0x2a3   : > { %s1669_s21 = smov %s1378_s24  ;;  %17 = sbr.rel (!%p15_p2) target bundleno = 3 (0x3), region = 75 }
 0x2a8   :  { %922 = vsyncpa [#allocation3], 1 }
 0x2a9   :  { %924 = vsyncpa [#allocation3 + $0x1], 1 }

</bundles_post_ra>
